<compile_context>
chip_gen: v7x
topology: tpu7x:2x2x1
jax: 0.10.0
libtpu: 0.0.40
codegen_flags: <defaults>
</compile_context>

<pallas_src>
import functools

import jax
import jax.numpy as jnp
import numpy as np
from jax.experimental import pallas as pl
from jax.experimental.pallas import tpu as pltpu

LANE = 128  # padded minor dim of the kernel output (lane-dense out DMA)


def _round_up(x, m):
    return (x + m - 1) // m * m


def _router_kernel(x_ref, w1_ref, b1_ref, w2_ref, b2_ref, wh_ref, bh_ref, out_ref,
                   *, num_families, num_gen_tasks):
    F = num_families
    Tg = num_gen_tasks
    W = F + Tg
    cdt = w1_ref.dtype                       # compute dtype for MXU operands (f32 or bf16)

    x = x_ref[...]

    # Fused layer 1: family layer-1 and generation sub-router layer-1 share x.
    y = jnp.dot(x.astype(cdt), w1_ref[...], preferred_element_type=jnp.float32) + b1_ref[...]
    y = jnp.maximum(y, 0.0)                  # ReLU -> [h1 | g1]

    # Fused layer 2: blockdiag(w2, I_Hg); ReLU on the g1 pass-through block is exact (g1 >= 0).
    z = jnp.dot(y.astype(cdt), w2_ref[...], preferred_element_type=jnp.float32) + b2_ref[...]
    z = jnp.maximum(z, 0.0)                  # -> [h2 | g1]

    # Fused heads: blockdiag(wo, wgo); clamp(temperature, 0.1) already folded into wh/bh.
    logits = jnp.dot(z.astype(cdt), wh_ref[...], preferred_element_type=jnp.float32) + bh_ref[...]

    # Combined two-segment softmax: ONE exp over all F+Tg lanes; segment max/sum via lane
    # masks.  Avoids the lane-offset slice relayout and halves EUP work vs two softmaxes.
    col = jax.lax.broadcasted_iota(jnp.int32, logits.shape, 1)
    fam_mask = col < F
    neg = jnp.float32(-jnp.inf)
    fam_max = jnp.max(jnp.where(fam_mask, logits, neg), axis=-1, keepdims=True)
    gen_max = jnp.max(jnp.where(fam_mask, neg, logits), axis=-1, keepdims=True)
    e = jnp.exp(logits - jnp.where(fam_mask, fam_max, gen_max))
    fam_sum = jnp.sum(jnp.where(fam_mask, e, 0.0), axis=-1, keepdims=True)
    gen_sum = jnp.sum(jnp.where(fam_mask, 0.0, e), axis=-1, keepdims=True)

    def _recip(d):
        # EUP approximate reciprocal + 2 Newton steps -> f32 accuracy, no vector divide.
        r = pl.reciprocal(d, approx=True)
        r = r * (2.0 - d * r)
        r = r * (2.0 - d * r)
        return r

    r_fam = _recip(fam_sum)
    r_gen = _recip(gen_sum)

    # Family prob of the last ("generation") family, extracted with a masked lane sum so no
    # lane-shift slice is needed.
    fam_last = jnp.sum(jnp.where(col == F - 1, e, 0.0), axis=-1, keepdims=True) * r_fam

    # Combined result: family probs in lanes [0, F), family-weighted generation probs in [F, W).
    combined = e * jnp.where(fam_mask, r_fam, r_gen * fam_last)

    # Single masked store.  Lanes [W, LANE) and padded rows are intentionally left untouched
    # (stale); the wrapper only ever reads out[:B, :W].
    out_ref[:, :W] = combined.astype(out_ref.dtype)


def pack_params(p, compute_dtype=jnp.float32):
    """Host-side, one-time packing of the raw per-layer parameters.

    compute_dtype=jnp.bfloat16 halves input/weight HBM bytes (recommended on v5e for large B);
    probabilities then deviate from the f32 reference by ~1e-3 instead of ~1e-7.
    """
    f32 = jnp.float32
    d_in, h1 = p["w1"].shape
    hg = p["wg1"].shape[1]
    h2 = p["w2"].shape[1]
    nf = p["wo"].shape[1]
    ng = p["wgo"].shape[1]

    # layer 1: concat along the output dim (both routers consume x)
    w1c = jnp.concatenate([p["w1"], p["wg1"]], axis=1)          # [D, H1+Hg]
    b1c = jnp.concatenate([p["b1"], p["bg1"]], axis=1)          # [1, H1+Hg]

    # layer 2: blockdiag(w2, I_Hg) so g1 passes through
    w2e = jnp.zeros((h1 + hg, h2 + hg), f32)
    w2e = w2e.at[:h1, :h2].set(p["w2"])
    w2e = w2e.at[h1:, h2:].set(jnp.eye(hg, dtype=f32))
    b2e = jnp.concatenate([p["b2"], jnp.zeros((1, hg), f32)], axis=1)

    # heads: blockdiag(wo, wgo) with clamp(temperature, 0.1) folded in
    inv_t = 1.0 / jnp.maximum(p["temp"][0], 0.1)
    inv_tg = 1.0 / jnp.maximum(p["tempg"][0], 0.1)
    whe = jnp.zeros((h2 + hg, nf + ng), f32)
    whe = whe.at[:h2, :nf].set(p["wo"] * inv_t)
    whe = whe.at[h2:, nf:].set(p["wgo"] * inv_tg)
    bhe = jnp.concatenate([p["bo"] * inv_t, p["bgo"] * inv_tg], axis=1)

    return {
        "w1": w1c.astype(compute_dtype), "b1": b1c,
        "w2": w2e.astype(compute_dtype), "b2": b2e,
        "wh": whe.astype(compute_dtype), "bh": bhe,
        "num_families": nf, "num_gen_tasks": ng,
    }


def hierarchical_router_forward(x, packed, *, tile_b_max=4096, out_dtype=jnp.float32,
                                x_buffer_depth=2, interpret=False):
    """Returns (routing_probs [B, (nf-1)+ng], family_probs [B, nf]) as float32."""
    B, d_in = x.shape
    nf = packed["num_families"]
    ng = packed["num_gen_tasks"]
    W = nf + ng
    assert W <= LANE, "family + generation lanes must fit inside the padded output width"

    w1, b1, w2, b2, wh, bh = (packed[k] for k in ("w1", "b1", "w2", "b2", "wh", "bh"))
    # Pass x already in w1.dtype upstream (e.g. bf16) to make this cast a no-op.
    x = x.astype(w1.dtype)

    # Tile selection: derive the tile from B to bound padding waste; use >= 2 tiles when
    # possible so both v7x TensorCores get work (harmless on single-TC v5e/v6e).
    n_tiles = pl.cdiv(B, tile_b_max)
    if B > 8 and n_tiles < 2:
        n_tiles = 2
    tile_b = max(8, _round_up(pl.cdiv(B, n_tiles), 8))
    b_pad = tile_b * n_tiles
    if b_pad != B:
        x = jnp.pad(x, ((0, b_pad - B), (0, 0)))

    def const_spec(a):
        return pl.BlockSpec(a.shape, lambda i: (0, 0))  # weights stay VMEM-resident

    x_spec_kwargs = {}
    if x_buffer_depth != 2:
        # Deeper input buffering (e.g. 3) helps v7x when the input DMA is exposed.
        x_spec_kwargs["pipeline_mode"] = pl.Buffered(x_buffer_depth)

    # Only raise the scoped VMEM limit when the tiles actually need it.
    in_bytes = tile_b * d_in * jnp.dtype(x.dtype).itemsize
    out_bytes = tile_b * LANE * jnp.dtype(out_dtype).itemsize
    w_bytes = sum(int(a.size) * jnp.dtype(a.dtype).itemsize for a in (w1, b1, w2, b2, wh, bh))
    vmem_est = max(2, x_buffer_depth) * in_bytes + 2 * out_bytes + 2 * w_bytes
    cp_kwargs = dict(dimension_semantics=("parallel",))
    if vmem_est > 24 * 1024 * 1024:
        cp_kwargs["vmem_limit_bytes"] = min(int(vmem_est * 2), 110 * 1024 * 1024)

    kernel = functools.partial(_router_kernel, num_families=nf, num_gen_tasks=ng)

    out = pl.pallas_call(
        kernel,
        out_shape=jax.ShapeDtypeStruct((b_pad, LANE), out_dtype),
        grid=(n_tiles,),
        in_specs=[
            pl.BlockSpec((tile_b, d_in), lambda i: (i, 0), **x_spec_kwargs),  # x: tiled over batch
            const_spec(w1), const_spec(b1),
            const_spec(w2), const_spec(b2),
            const_spec(wh), const_spec(bh),
        ],
        out_specs=pl.BlockSpec((tile_b, LANE), lambda i: (i, 0)),
        compiler_params=pltpu.CompilerParams(**cp_kwargs),
        interpret=interpret,
    )(x, w1, b1, w2, b2, wh, bh)

    # NOTE: only lanes [0, W) and rows [0, B) of `out` are defined; never read beyond them.
    fam = out[:B, :nf].astype(jnp.float32)
    gen_w = out[:B, nf:W].astype(jnp.float32)
    routing_probs = jnp.concatenate([fam[:, :nf - 1], gen_w], axis=-1)  # tiny [B,5] plumbing
    return routing_probs, fam


def init_params(key, d_in=64, h1=32, h2=16, num_families=3, num_gen_tasks=3):
    """Deterministic synthetic init mirroring DynamicRouter.reset_parameters():
    kaiming_uniform(a=sqrt(5)) => U(-1/sqrt(fan_in), 1/sqrt(fan_in)) for hidden layers,
    N(0, 0.02) for output heads, zero biases, temperature=1.0."""
    hg = h2 // 2  # sub-router hidden: hidden_sizes[-1] // 2
    ks = jax.random.split(key, 6)

    def ku(k, fan_in, fan_out):
        bound = 1.0 / np.sqrt(fan_in)
        return jax.random.uniform(k, (fan_in, fan_out), jnp.float32, -bound, bound)

    return {
        "w1": ku(ks[0], d_in, h1), "b1": jnp.zeros((1, h1), jnp.float32),
        "w2": ku(ks[1], h1, h2),   "b2": jnp.zeros((1, h2), jnp.float32),
        "wo": 0.02 * jax.random.normal(ks[2], (h2, num_families), jnp.float32),
        "bo": jnp.zeros((1, num_families), jnp.float32),
        "temp": jnp.ones((1,), jnp.float32),
        "wg1": ku(ks[3], d_in, hg), "bg1": jnp.zeros((1, hg), jnp.float32),
        "wgo": 0.02 * jax.random.normal(ks[4], (hg, num_gen_tasks), jnp.float32),
        "bgo": jnp.zeros((1, num_gen_tasks), jnp.float32),
        "tempg": jnp.ones((1,), jnp.float32),
    }


def reference_forward(x, p):
    """Pure-JAX reference matching the PyTorch forward (eval mode)."""
    h1 = jnp.maximum(x @ p["w1"] + p["b1"], 0.0)
    h2 = jnp.maximum(h1 @ p["w2"] + p["b2"], 0.0)
    fam_logits = h2 @ p["wo"] + p["bo"]
    fam_probs = jax.nn.softmax(fam_logits / jnp.maximum(p["temp"][0], 0.1), axis=-1)

    g1 = jnp.maximum(x @ p["wg1"] + p["bg1"], 0.0)
    g_logits = g1 @ p["wgo"] + p["bgo"]
    gen_probs = jax.nn.softmax(g_logits / jnp.maximum(p["tempg"][0], 0.1), axis=-1)
    gen_probs = gen_probs * fam_probs[:, 2:3]

    probs = jnp.concatenate([fam_probs[:, 0:1], fam_probs[:, 1:2], gen_probs], axis=-1)
    return probs, fam_probs


if __name__ == "__main__":
    key = jax.random.PRNGKey(0)
    kx, kx2, kp = jax.random.split(key, 3)

    D_IN = 64
    params = init_params(kp, d_in=D_IN, h1=32, h2=16, num_families=3, num_gen_tasks=3)
    packed = pack_params(params)  # f32 operands; pass compute_dtype=jnp.bfloat16 for v5e/large B

    # Small batch (single tile).
    B = 8
    x = jax.random.normal(kx, (B, D_IN), jnp.float32)
    probs, fam_probs = hierarchical_router_forward(x, packed)
    jax.block_until_ready((probs, fam_probs))

    ref_probs, ref_fam = reference_forward(x, params)
    assert probs.shape == (B, 5) and fam_probs.shape == (B, 3)
    assert np.allclose(np.asarray(probs), np.asarray(ref_probs), atol=1e-5)
    assert np.allclose(np.asarray(fam_probs), np.asarray(ref_fam), atol=1e-5)
    assert np.allclose(np.asarray(probs).sum(-1), 1.0, atol=1e-5)

    # Odd batch (exercises multi-tile grid + batch padding path).
    B2 = 300
    x2 = jax.random.normal(kx2, (B2, D_IN), jnp.float32)
    probs2, fam2 = hierarchical_router_forward(x2, packed)
    jax.block_until_ready((probs2, fam2))
    ref_probs2, ref_fam2 = reference_forward(x2, params)
    assert probs2.shape == (B2, 5) and fam2.shape == (B2, 3)
    assert np.allclose(np.asarray(probs2), np.asarray(ref_probs2), atol=1e-5)
    assert np.allclose(np.asarray(fam2), np.asarray(ref_fam2), atol=1e-5)
    assert np.allclose(np.asarray(probs2).sum(-1), 1.0, atol=1e-5)

    print("KERNEL_OK")
</pallas_src>

<mosaic_0001>
module attributes {stable_mosaic.version = 11 : i64} {
  func.func @_router_kernel(%arg0: i32, %arg1: memref<8x64xf32, #tpu.memory_space<vmem>>, %arg2: memref<64x40xf32, #tpu.memory_space<vmem>>, %arg3: memref<1x40xf32, #tpu.memory_space<vmem>>, %arg4: memref<40x24xf32, #tpu.memory_space<vmem>>, %arg5: memref<1x24xf32, #tpu.memory_space<vmem>>, %arg6: memref<24x6xf32, #tpu.memory_space<vmem>>, %arg7: memref<1x6xf32, #tpu.memory_space<vmem>>, %arg8: memref<8x128xf32, #tpu.memory_space<vmem>>) attributes {dimension_semantics = [#tpu.dimension_semantics<parallel>], iteration_bounds = array<i64: 1>, scalar_prefetch = 0 : i64, scratch_operands = 0 : i64, tpu.core_type = #tpu.core_type<tc>, window_params = [{transform_indices = @transform_0, window_bounds = array<i64: 8, 64>}, {pipeline_mode = #tpu.pipeline_mode<synchronous>, transform_indices = @transform_1, window_bounds = array<i64: 64, 40>}, {pipeline_mode = #tpu.pipeline_mode<synchronous>, transform_indices = @transform_2, window_bounds = array<i64: 1, 40>}, {pipeline_mode = #tpu.pipeline_mode<synchronous>, transform_indices = @transform_3, window_bounds = array<i64: 40, 24>}, {pipeline_mode = #tpu.pipeline_mode<synchronous>, transform_indices = @transform_4, window_bounds = array<i64: 1, 24>}, {pipeline_mode = #tpu.pipeline_mode<synchronous>, transform_indices = @transform_5, window_bounds = array<i64: 24, 6>}, {pipeline_mode = #tpu.pipeline_mode<synchronous>, transform_indices = @transform_6, window_bounds = array<i64: 1, 6>}, {transform_indices = @transform_7, window_bounds = array<i64: 8, 128>}]} {
    %c0 = arith.constant 0 : index
    %c0_0 = arith.constant 0 : index
    %0 = vector.load %arg1[%c0, %c0_0] : memref<8x64xf32, #tpu.memory_space<vmem>>, vector<8x64xf32>
    %c0_1 = arith.constant 0 : index
    %c0_2 = arith.constant 0 : index
    %1 = vector.load %arg2[%c0_1, %c0_2] : memref<64x40xf32, #tpu.memory_space<vmem>>, vector<64x40xf32>
    %cst = arith.constant dense<0.000000e+00> : vector<8x40xf32>
    %2 = tpu.matmul %0, %1, %cst {dimension_numbers = #tpu.dot_dimension_numbers<[1], [0], [0], [1], [0, 0, 1, 1], [], []>} : vector<8x64xf32>, vector<64x40xf32>, vector<8x40xf32> -> vector<8x40xf32>
    %c0_3 = arith.constant 0 : index
    %c0_4 = arith.constant 0 : index
    %3 = vector.load %arg3[%c0_3, %c0_4] : memref<1x40xf32, #tpu.memory_space<vmem>>, vector<1x40xf32>
    %4 = vector.broadcast %3 : vector<1x40xf32> to vector<8x40xf32>
    %5 = arith.addf %2, %4 : vector<8x40xf32>
    %cst_5 = arith.constant 0.000000e+00 : f32
    %6 = vector.broadcast %cst_5 : f32 to vector<8x40xf32>
    %7 = arith.maximumf %5, %6 : vector<8x40xf32>
    %c0_6 = arith.constant 0 : index
    %c0_7 = arith.constant 0 : index
    %8 = vector.load %arg4[%c0_6, %c0_7] : memref<40x24xf32, #tpu.memory_space<vmem>>, vector<40x24xf32>
    %cst_8 = arith.constant dense<0.000000e+00> : vector<8x24xf32>
    %9 = tpu.matmul %7, %8, %cst_8 {dimension_numbers = #tpu.dot_dimension_numbers<[1], [0], [0], [1], [0, 0, 1, 1], [], []>} : vector<8x40xf32>, vector<40x24xf32>, vector<8x24xf32> -> vector<8x24xf32>
    %c0_9 = arith.constant 0 : index
    %c0_10 = arith.constant 0 : index
    %10 = vector.load %arg5[%c0_9, %c0_10] : memref<1x24xf32, #tpu.memory_space<vmem>>, vector<1x24xf32>
    %11 = vector.broadcast %10 : vector<1x24xf32> to vector<8x24xf32>
    %12 = arith.addf %9, %11 : vector<8x24xf32>
    %cst_11 = arith.constant 0.000000e+00 : f32
    %13 = vector.broadcast %cst_11 : f32 to vector<8x24xf32>
    %14 = arith.maximumf %12, %13 : vector<8x24xf32>
    %c0_12 = arith.constant 0 : index
    %c0_13 = arith.constant 0 : index
    %15 = vector.load %arg6[%c0_12, %c0_13] : memref<24x6xf32, #tpu.memory_space<vmem>>, vector<24x6xf32>
    %cst_14 = arith.constant dense<0.000000e+00> : vector<8x6xf32>
    %16 = tpu.matmul %14, %15, %cst_14 {dimension_numbers = #tpu.dot_dimension_numbers<[1], [0], [0], [1], [0, 0, 1, 1], [], []>} : vector<8x24xf32>, vector<24x6xf32>, vector<8x6xf32> -> vector<8x6xf32>
    %c0_15 = arith.constant 0 : index
    %c0_16 = arith.constant 0 : index
    %17 = vector.load %arg7[%c0_15, %c0_16] : memref<1x6xf32, #tpu.memory_space<vmem>>, vector<1x6xf32>
    %18 = vector.broadcast %17 : vector<1x6xf32> to vector<8x6xf32>
    %19 = arith.addf %16, %18 : vector<8x6xf32>
    %20 = tpu.iota {dimensions = array<i32: 1>} : vector<8x6xi32>
    %c3_i32 = arith.constant 3 : i32
    %21 = vector.broadcast %c3_i32 : i32 to vector<8x6xi32>
    %22 = arith.cmpi slt, %20, %21 : vector<8x6xi32>
    %cst_17 = arith.constant 0xFF800000 : f32
    %23 = vector.broadcast %cst_17 : f32 to vector<8x6xf32>
    %24 = arith.select %22, %19, %23 : vector<8x6xi1>, vector<8x6xf32>
    %cst_18 = arith.constant dense<0xFF800000> : vector<8xf32>
    %25 = vector.multi_reduction <maximumf>, %24, %cst_18 [1] : vector<8x6xf32> to vector<8xf32>
    %26 = vector.shape_cast %25 : vector<8xf32> to vector<8x1xf32>
    %cst_19 = arith.constant 0xFF800000 : f32
    %27 = vector.broadcast %cst_19 : f32 to vector<8x6xf32>
    %28 = arith.select %22, %27, %19 : vector<8x6xi1>, vector<8x6xf32>
    %cst_20 = arith.constant dense<0xFF800000> : vector<8xf32>
    %29 = vector.multi_reduction <maximumf>, %28, %cst_20 [1] : vector<8x6xf32> to vector<8xf32>
    %30 = vector.shape_cast %29 : vector<8xf32> to vector<8x1xf32>
    %31 = vector.shape_cast %26 : vector<8x1xf32> to vector<8x1xf32>
    %32 = vector.broadcast %31 : vector<8x1xf32> to vector<8x6xf32>
    %33 = vector.shape_cast %30 : vector<8x1xf32> to vector<8x1xf32>
    %34 = vector.broadcast %33 : vector<8x1xf32> to vector<8x6xf32>
    %35 = arith.select %22, %32, %34 : vector<8x6xi1>, vector<8x6xf32>
    %36 = arith.subf %19, %35 : vector<8x6xf32>
    %37 = math.exp %36 : vector<8x6xf32>
    %cst_21 = arith.constant 0.000000e+00 : f32
    %38 = vector.broadcast %cst_21 : f32 to vector<8x6xf32>
    %39 = arith.select %22, %37, %38 : vector<8x6xi1>, vector<8x6xf32>
    %cst_22 = arith.constant dense<0.000000e+00> : vector<8xf32>
    %40 = vector.multi_reduction <add>, %39, %cst_22 [1] : vector<8x6xf32> to vector<8xf32>
    %41 = vector.shape_cast %40 : vector<8xf32> to vector<8x1xf32>
    %cst_23 = arith.constant 0.000000e+00 : f32
    %42 = vector.broadcast %cst_23 : f32 to vector<8x6xf32>
    %43 = arith.select %22, %42, %37 : vector<8x6xi1>, vector<8x6xf32>
    %cst_24 = arith.constant dense<0.000000e+00> : vector<8xf32>
    %44 = vector.multi_reduction <add>, %43, %cst_24 [1] : vector<8x6xf32> to vector<8xf32>
    %45 = vector.shape_cast %44 : vector<8xf32> to vector<8x1xf32>
    %46 = tpu.reciprocal %41 {approx = true} : vector<8x1xf32> -> vector<8x1xf32>
    %47 = arith.mulf %41, %46 : vector<8x1xf32>
    %cst_25 = arith.constant 2.000000e+00 : f32
    %48 = vector.broadcast %cst_25 : f32 to vector<8x1xf32>
    %49 = arith.subf %48, %47 : vector<8x1xf32>
    %50 = arith.mulf %46, %49 : vector<8x1xf32>
    %51 = arith.mulf %41, %50 : vector<8x1xf32>
    %cst_26 = arith.constant 2.000000e+00 : f32
    %52 = vector.broadcast %cst_26 : f32 to vector<8x1xf32>
    %53 = arith.subf %52, %51 : vector<8x1xf32>
    %54 = arith.mulf %50, %53 : vector<8x1xf32>
    %55 = tpu.reciprocal %45 {approx = true} : vector<8x1xf32> -> vector<8x1xf32>
    %56 = arith.mulf %45, %55 : vector<8x1xf32>
    %cst_27 = arith.constant 2.000000e+00 : f32
    %57 = vector.broadcast %cst_27 : f32 to vector<8x1xf32>
    %58 = arith.subf %57, %56 : vector<8x1xf32>
    %59 = arith.mulf %55, %58 : vector<8x1xf32>
    %60 = arith.mulf %45, %59 : vector<8x1xf32>
    %cst_28 = arith.constant 2.000000e+00 : f32
    %61 = vector.broadcast %cst_28 : f32 to vector<8x1xf32>
    %62 = arith.subf %61, %60 : vector<8x1xf32>
    %63 = arith.mulf %59, %62 : vector<8x1xf32>
    %c2_i32 = arith.constant 2 : i32
    %64 = vector.broadcast %c2_i32 : i32 to vector<8x6xi32>
    %65 = arith.cmpi eq, %20, %64 : vector<8x6xi32>
    %cst_29 = arith.constant 0.000000e+00 : f32
    %66 = vector.broadcast %cst_29 : f32 to vector<8x6xf32>
    %67 = arith.select %65, %37, %66 : vector<8x6xi1>, vector<8x6xf32>
    %cst_30 = arith.constant dense<0.000000e+00> : vector<8xf32>
    %68 = vector.multi_reduction <add>, %67, %cst_30 [1] : vector<8x6xf32> to vector<8xf32>
    %69 = vector.shape_cast %68 : vector<8xf32> to vector<8x1xf32>
    %70 = arith.mulf %69, %54 : vector<8x1xf32>
    %71 = arith.mulf %63, %70 : vector<8x1xf32>
    %72 = vector.shape_cast %54 : vector<8x1xf32> to vector<8x1xf32>
    %73 = vector.broadcast %72 : vector<8x1xf32> to vector<8x6xf32>
    %74 = vector.shape_cast %71 : vector<8x1xf32> to vector<8x1xf32>
    %75 = vector.broadcast %74 : vector<8x1xf32> to vector<8x6xf32>
    %76 = arith.select %22, %73, %75 : vector<8x6xi1>, vector<8x6xf32>
    %77 = arith.mulf %37, %76 : vector<8x6xf32>
    %c0_31 = arith.constant 0 : index
    %c0_32 = arith.constant 0 : index
    %78 = vector.load %arg8[%c0_31, %c0_32] : memref<8x128xf32, #tpu.memory_space<vmem>>, vector<8x6xf32>
    tpu.vector_store %arg8[%c0_31, %c0_32], %77 {strides = array<i32>} : memref<8x128xf32, #tpu.memory_space<vmem>>, vector<8x6xf32>,
    return
  }
  func.func @transform_0(%arg0: i32) -> (i32, i32) {
    %c0_i32 = arith.constant 0 : i32
    %c0_i32_0 = arith.constant 0 : i32
    return %arg0, %c0_i32 : i32, i32
  }
  func.func @transform_1(%arg0: i32) -> (i32, i32) {
    %c0_i32 = arith.constant 0 : i32
    %c0_i32_0 = arith.constant 0 : i32
    %c0_i32_1 = arith.constant 0 : i32
    return %c0_i32, %c0_i32_0 : i32, i32
  }
  func.func @transform_2(%arg0: i32) -> (i32, i32) {
    %c0_i32 = arith.constant 0 : i32
    %c0_i32_0 = arith.constant 0 : i32
    %c0_i32_1 = arith.constant 0 : i32
    return %c0_i32, %c0_i32_0 : i32, i32
  }
  func.func @transform_3(%arg0: i32) -> (i32, i32) {
    %c0_i32 = arith.constant 0 : i32
    %c0_i32_0 = arith.constant 0 : i32
    %c0_i32_1 = arith.constant 0 : i32
    return %c0_i32, %c0_i32_0 : i32, i32
  }
  func.func @transform_4(%arg0: i32) -> (i32, i32) {
    %c0_i32 = arith.constant 0 : i32
    %c0_i32_0 = arith.constant 0 : i32
    %c0_i32_1 = arith.constant 0 : i32
    return %c0_i32, %c0_i32_0 : i32, i32
  }
  func.func @transform_5(%arg0: i32) -> (i32, i32) {
    %c0_i32 = arith.constant 0 : i32
    %c0_i32_0 = arith.constant 0 : i32
    %c0_i32_1 = arith.constant 0 : i32
    return %c0_i32, %c0_i32_0 : i32, i32
  }
  func.func @transform_6(%arg0: i32) -> (i32, i32) {
    %c0_i32 = arith.constant 0 : i32
    %c0_i32_0 = arith.constant 0 : i32
    %c0_i32_1 = arith.constant 0 : i32
    return %c0_i32, %c0_i32_0 : i32, i32
  }
  func.func @transform_7(%arg0: i32) -> (i32, i32) {
    %c0_i32 = arith.constant 0 : i32
    %c0_i32_0 = arith.constant 0 : i32
    return %arg0, %c0_i32 : i32, i32
  }
}

</mosaic_0001>

<bundles_post_ra>
// kernel: tpu_custom_call.1
= control target key start
LH: loop header
LB: loop body
LE: loop exit
PB: predicated region body
PF: predicated region fallthrough
CT: control target
= control target key end

     0   :  { %v472_v3 = vmov 0.0|0.0   ;;  %vm473_vm0 = vmmov 0   ;;  %v474_v6 = vmov 0.0   ;;  %s603_s0 = inlined_call_operand.vmem [shape: f32[8,64], index: 0, kind: input, shape index: {}]   ;;  %s604_s1 = inlined_call_operand.vmem [shape: f32[64,40], index: 1, kind: input, shape index: {}]   ;;  %s605_s2 = inlined_call_operand.vmem [shape: f32[1,40], index: 2, kind: input, shape index: {}]   ;;  %s606_s3 = inlined_call_operand.vmem [shape: f32[40,24], index: 3, kind: input, shape index: {}]   ;;  %s607_s4 = inlined_call_operand.vmem [shape: f32[1,24], index: 4, kind: input, shape index: {}]   ;;  %s608_s5 = inlined_call_operand.vmem [shape: f32[24,6], index: 5, kind: input, shape index: {}]   ;;  %s609_s6 = inlined_call_operand.vmem [shape: f32[1,6], index: 6, kind: input, shape index: {}]   ;;  %s610_s7 = inlined_call_operand.hbm [shape: f32[8,128], index: 7, kind: output, shape index: {}]  }
   0x1   :  { %v28_v0 = vld [vmem:[%s604_s1] sm:$0xff]  ;;  %v29_v1 = vld [vmem:[%s604_s1 + $0x8] sm:$0xff]  ;;  %v30_v2 = vld [vmem:[%s604_s1 + $0x10] sm:$0xff]  ;;  %417 = vmatprep.subr.bf16.mxu0 %v472_v3  ;;  %392 = vmatprep.mubr.msk.f32.mxu0 %vm473_vm0, %v474_v6 }
   0x2   :  { %v418_v4 = vpack.c.bf16 %v29_v1, %v28_v0  ;;  %v31_v5 = vld [vmem:[%s604_s1 + $0x18] sm:$0xff]  ;;  %429 = vmatprep.subr.bf16.mxu1 %v472_v3  ;;  %405 = vmatprep.mubr.msk.f32.mxu1 %vm473_vm0, %v474_v6  ;;  %v118_v8 = vld [vmem:[%s606_s3] sm:$0xff]  ;;  %v119_v9 = vld [vmem:[%s606_s3 + $0x8] sm:$0xff] }
   0x3   :  { %v421_v7 = vpack.c.bf16 %v31_v5, %v30_v2  ;;  %v32_v10 = vld [vmem:[%s604_s1 + $0x20] sm:$0xff]  ;;  %v33_v11 = vld [vmem:[%s604_s1 + $0x28] sm:$0xff]  ;;  %v430_v12 = vpack.c.bf16 %v119_v9, %v118_v8 }
   0x4   :  { %419 = vmatpush3.bf16.msra.mxu0 %v418_v4 }
   0x5   :  { %420 = vmatprep.subr.bf16.mxu0 %v472_v3 }
   0x6   :  { %12 = vsyncpa [#allocation3], 0  ;;  %431 = vmatpush3.bf16.msra.mxu1 %v430_v12  ;;  %v424_v13 = vpack.c.bf16 %v33_v11, %v32_v10  ;;  %v34_v14 = vld [vmem:[%s604_s1 + $0x30] sm:$0xff]  ;;  %v35_v15 = vld [vmem:[%s604_s1 + $0x38] sm:$0xff]  ;;  %vm43_vm1 = vcmask 523264   ;;  %vm130_vm2 = vcmask 326656   ;;  %v289_v36 = vlaneseq }
   0x7   :  { %432 = vmatprep.subr.bf16.mxu1 %v472_v3  ;;  %v427_v16 = vpack.c.bf16 %v35_v15, %v34_v14  ;;  %v27_v17 = vld [vmem:[%s603_s0] sm:$0xff]  ;;  %v120_v18 = vld [vmem:[%s606_s3 + $0x10] sm:$0xff]  ;;  %v121_v19 = vld [vmem:[%s606_s3 + $0x18] sm:$0xff]  ;;  %vm215_vm3 = vcmask 195584   ;;  %vm293_vm5 = vcmask 48128  }
   0x8   :  { %422 = vmatpush3.bf16.msra.mxu0 %v421_v7  ;;  %v433_v20 = vpack.c.bf16 %v121_v19, %v120_v18  ;;  %v122_v21 = vld [vmem:[%s606_s3 + $0x20] sm:$0xff]  ;;  %v206_v24 = vld [vmem:[%s608_s5 + $0x8] sm:$0xff]  ;;  %v207_v30 = vld [vmem:[%s608_s5 + $0x10] sm:$0xff]  ;;  %v290_v37 = vand.u32 127, %v289_v36 }
   0x9   :  { %423 = vmatprep.subr.bf16.mxu0 %v472_v3  ;;  %v351_v22 = vld [vmem:[%s605_s2] ss:$0 sm:$0xff] }
   0xa   :  { %434 = vmatpush3.bf16.msra.mxu1 %v433_v20  ;;  %v205_v23 = vld [vmem:[%s608_s5] sm:$0xff]  ;;  %vm291_vm4 = vcmp.lt.s32.totalorder %v290_v37, 3  ;;  %vm327_vm6 = vcmp.eq.s32.totalorder %v290_v37, 2 }
   0xb   :  { %403 = vmatprep.subr.mxu1 %v474_v6  ;;  %v436_v28 = vpack.c.bf16 %v206_v24, %v205_v23  ;;  %v353_v31 = vld [vmem:[%s607_s4] ss:$0 sm:$0xff]  ;;  %s475_s4 = smov [#allocation2]  }
   0xc   :  { %425 = vmatpush3.bf16.msra.mxu0 %v424_v13  ;;  %v355_v38 = vld [vmem:[%s609_s6] ss:$0 sm:$0xff]  ;;  %s343_s5 = sshll.u32 %s475_s4, 4  ;;  %s344_s5 = int_to_ptr.vmem [resolvable:$true] %s343_s5 }
   0xd   :  { %426 = vmatprep.subr.bf16.mxu0 %v472_v3  ;;  %s448_s6 = scalar_lea.vmem %s344_s5, 128  ;;  %p453_p1 = scmp.lt.s32.totalorder %s344_s5, %s344_s5 }
   0xe   :  { %404 = vmatpush3.msra.mxu1 %v122_v21  ;;  %p449_p0 = scmp.ne.s32.totalorder %s344_s5, %s448_s6  ;;  %p454_p2 = scmp.lt.s32.totalorder %s448_s6, %s448_s6 }
   0xf   :  { %435 = vmatprep.subr.bf16.mxu1 %v472_v3 }
  0x10   :  { %428 = vmatpush3.bf16.msra.mxu0 %v427_v16  ;;  %p455_p3 = por %p454_p2, %p453_p1 }
  0x12   :  { %p456_p4 = pnand %p455_p3, %p449_p0 }
  0x13   :  { %393 = vmatmul.mubr.msk.f32.vlgmr.msra.gmra.mrb[0].mxu0 %vm43_vm1, %v27_v17 }
  0xe6   :  { %v113_v25 = vpop.f32.mrb[0].mxu0 }
  0xe7   :  { %v114_v26 = vadd.f32 %v351_v22, %v113_v25  ;;  %v394_v27 = vpop.f32.mrb[1].mxu0 }
  0xe9   :  { %v117_v29 = vmax.f32 %v114_v26, 0.0 }
  0xeb   :  { %406 = vmatmul.mubr.msk.f32.vlgmr.msra.gmra.mrb[0].mxu1 %vm130_vm2, %v117_v29 }
  0xec   :  { %437 = vmatpush3.bf16.msra.mxu1 %v436_v28  ;;  %414 = vmatprep.mubr.msk.f32.mxu1 %vm473_vm0, %v474_v6 }
  0xed   :  { %412 = vmatprep.subr.mxu1 %v474_v6 }
  0xf0   :  { %413 = vmatpush3.msra.mxu1 %v207_v30 }
 0x1be   :  { %v200_v32 = vpop.f32.mrb[0].mxu1 }
 0x1bf   :  { %v201_v33 = vadd.f32 %v353_v31, %v200_v32  ;;  %v407_v34 = vpop.f32.mrb[1].mxu1 }
 0x1c1   :  { %v204_v35 = vmax.f32 %v201_v33, 0.0 }
 0x1c3   :  { %415 = vmatmul.mubr.msk.f32.vlgmr.msra.gmra.mrb[2].mxu1 %vm215_vm3, %v204_v35 }
 0x296   :  { %v285_v39 = vpop.f32.mrb[2].mxu1 }
 0x297   :  { %v286_v40 = vadd.f32 %v355_v38, %v285_v39  ;;  %v416_v41 = vpop.f32.mrb[3].mxu1 }
 0x299   :  { %v292_v42 = vsel %vm291_vm4, %v286_v40, -inf  ;;  %v297_v44 = vsel %vm291_vm4, -inf, %v286_v40 }
 0x29a   :  { %v294_v43 = vsel %vm293_vm5, %v292_v42, -inf  ;;  %v298_v45 = vsel %vm293_vm5, %v297_v44, -inf }
 0x29b   :  { %295 = vmax.xlane.f32.xlu0 %v294_v43 }
 0x29f   :  { %299 = vmax.xlane.f32.xlu0 %v298_v45 }
 0x328   :  { %v296_v46 = vpop.xlane.xlu0 %295 }
 0x32c   :  { %v300_v47 = vpop.xlane.xlu0 %299 }
 0x32d   :  { %v301_v48 = vsel %vm291_vm4, %v296_v46, %v300_v47 }
 0x32e   :  { %v302_v49 = vsub.f32 %v286_v40, %v301_v48 }
 0x330   :  { %v303_v50 = vmul.f32 1.442695, %v302_v49 }
 0x332   :  { %442 = vpow2.f32 %v303_v50 }
 0x33c   :  { %v443_v51 = vpop.eup %442 }
 0x33d   :  { %v328_v52 = vsel %vm327_vm6, %v443_v51, 0.0  ;;  %v305_v53 = vsel %vm291_vm4, %v443_v51, 0.0  ;;  %v309_v56 = vsel %vm291_vm4, 0.0, %v443_v51 }
 0x33e   :  { %v329_v54 = vsel %vm293_vm5, %v328_v52, 0.0  ;;  %v306_v55 = vsel %vm293_vm5, %v305_v53, 0.0  ;;  %v310_v57 = vsel %vm293_vm5, %v309_v56, 0.0 }
 0x33f   :  { %330 = vadd.xlane.f32.xlu0 %v329_v54  ;;  %307 = vadd.xlane.f32.xlu1 %v306_v55 }
 0x343   :  { %311 = vadd.xlane.f32.xlu1 %v310_v57 }
 0x3cc   :  { %v308_v58 = vpop.xlane.xlu1 %307  ;;  %v331_v9 = vpop.xlane.xlu0 %330 }
 0x3cd   :  { %444 = vrcp.f32 %v308_v58 }
 0x3d0   :  { %v312_v59 = vpop.xlane.xlu1 %311 }
 0x3d1   :  { %446 = vrcp.f32 %v312_v59 }
 0x3d7   :  { %v445_v60 = vpop.eup %444 }
 0x3d8   :  { %v314_v61 = vmul.f32 %v445_v60, %v308_v58 }
 0x3da   :  { %v315_v62 = vsub.f32 2.0, %v314_v61 }
 0x3db   :  { %v447_v63 = vpop.eup %446 }
 0x3dc   :  { %v316_v0 = vmul.f32 %v445_v60, %v315_v62  ;;  %v321_v1 = vmul.f32 %v447_v63, %v312_v59 }
 0x3de   :  { %v317_v2 = vmul.f32 %v316_v0, %v308_v58  ;;  %v322_v3 = vsub.f32 2.0, %v321_v1 }
 0x3e0   :  { %v318_v4 = vsub.f32 2.0, %v317_v2  ;;  %v323_v5 = vmul.f32 %v447_v63, %v322_v3 }
 0x3e2   :  { %v319_v6 = vmul.f32 %v318_v4, %v316_v0  ;;  %v324_v7 = vmul.f32 %v323_v5, %v312_v59 }
 0x3e4   :  { %v325_v8 = vsub.f32 2.0, %v324_v7  ;;  %v332_v10 = vmul.f32 %v331_v9, %v319_v6 }
 0x3e6   :  { %v326_v11 = vmul.f32 %v325_v8, %v323_v5 }
 0x3e8   :  { %v333_v12 = vmul.f32 %v332_v10, %v326_v11 }
 0x3ea   :  { %v334_v13 = vsel %vm291_vm4, %v319_v6, %v333_v12 }
 0x3eb   :  { %v335_v14 = vmul.f32 %v443_v51, %v334_v13 }
 0x3ed   :  { %336 = vst.msk [vmem:[#allocation2] sm:$0xff] %vm293_vm5, %v335_v14 }
 0x3ee   :  { %459 = shalt.err (!%p456_p4)
}
 0x3ef   :  { %s460_s16 = scalar_lea.hbm %s610_s7, 128 }
 0x3f0   :  { %p461_p5 = scmp.ne.s32.totalorder %s610_s7, %s460_s16  ;;  %p464_p6 = scmp.lt.u32.totalorder %s460_s16, %s610_s7 }
 0x3f2   :  { %p466_p7 = pnand %p464_p6, %p461_p5 }
 0x3f4   :  { %469 = shalt.err (!%p466_p7)
}
 0x3f5   :  { %346 = dma.vmem_to_hbm [thread:$0]  %s344_s5, 128, %s610_s7, [#allocation3]  }
 0x3f6   :  { %470 = dma.done.wait [#allocation3], 128  }
 0x3f7   :  { %471 = vsyncadd [#allocation3], 4294967168 }
 0x3f8   :  { %350 = vsyncpa [#allocation3], 1 }

</bundles_post_ra>
